<compile_context>
chip_gen: v7x
topology: tpu7x:2x2x1
jax: 0.10.0
libtpu: 0.0.40
codegen_flags: <defaults>
</compile_context>

<pallas_src>
import jax
import jax.numpy as jnp
from jax.experimental import pallas as pl
from jax.experimental.pallas import tpu as pltpu

_LANES = 128
_BLOCK_ROWS = 8192    # (8192, 128) f32 = 4 MiB per input block per pipeline buffer
_CHUNK_ROWS = 1024    # in-kernel sub-chunk: bounds elementwise temporaries to ~0.5 MiB
_ACC_ROWS = 64        # fixed (64, 128) f32 accumulator bank (32 KiB), block-size independent


def _accumulate_valid_rows(rp_ref, rt_ref, acc_ref, valid_rows):
    """Fold sum((p - t)^2) over the first `valid_rows` rows of the current block
    into the (_ACC_ROWS, 128) accumulator bank.

    Only valid rows are ever read, so a partial last block needs no masking.
    All row counts are static; only the chunk-loop index is dynamic.
    """
    nfull = valid_rows // _CHUNK_ROWS
    rem = valid_rows - nfull * _CHUNK_ROWS
    rem64 = (rem // _ACC_ROWS) * _ACC_ROWS
    tail = rem - rem64                      # < _ACC_ROWS

    def piece(r0, nrows):
        # nrows is a static multiple of _ACC_ROWS; pure VPU work, hidden under DMA.
        d = (rp_ref[pl.ds(r0, nrows), :].astype(jnp.float32)
             - rt_ref[pl.ds(r0, nrows), :].astype(jnp.float32))
        sq = d * d
        if nrows > _ACC_ROWS:
            sq = jnp.sum(sq.reshape(nrows // _ACC_ROWS, _ACC_ROWS, _LANES), axis=0)
        acc_ref[...] += sq

    if nfull == 1:
        piece(0, _CHUNK_ROWS)
    elif nfull > 1:
        @pl.loop(0, nfull)
        def _chunks(c):
            piece(pl.multiple_of(c * _CHUNK_ROWS, _CHUNK_ROWS), _CHUNK_ROWS)

    if rem64 > 0:
        piece(nfull * _CHUNK_ROWS, rem64)

    if tail > 0:
        r0 = nfull * _CHUNK_ROWS + rem64
        d = (rp_ref[pl.ds(r0, tail), :].astype(jnp.float32)
             - rt_ref[pl.ds(r0, tail), :].astype(jnp.float32))
        acc_ref[0:tail, :] += d * d


def _make_multitask_kernel(*, w_recon, w_cls, n_recon_elems, n_cls_rows,
                           num_tiles, block_rows, valid_last):
    """Build the fused multitask-loss kernel with static (normalized) weights."""
    inv_recon = 1.0 / float(n_recon_elems)
    inv_cls = 1.0 / float(n_cls_rows)

    def kernel(rp_ref, rt_ref, logits_ref, labels_ref,
               total_ref, recon_ref, cls_ref, acc_ref, ce_ref):
        step = pl.program_id(0)

        @pl.when(step == 0)
        def _init():
            acc_ref[...] = jnp.zeros_like(acc_ref)

        # ---- "classification": cross-entropy once, at step 0, so its EUP/XLU
        # work hides under the prefetch of reconstruction tile 1 -------------
        @pl.when(step == 0)
        def _cross_entropy():
            logits = logits_ref[...].astype(jnp.float32)
            m = jnp.max(logits, axis=-1, keepdims=True)
            lse = jnp.log(jnp.sum(jnp.exp(logits - m), axis=-1, keepdims=True)) + m
            logp = logits - lse
            cls_ids = jax.lax.broadcasted_iota(jnp.int32, logits.shape, 1)
            onehot = (cls_ids == labels_ref[...]).astype(jnp.float32)
            ce = -jnp.sum(onehot * logp) * inv_cls
            cls_ref[0, 0] = ce
            ce_ref[0] = ce

        # ---- "reconstruction" (MSE) partials: VPU-only fold into the bank ----
        if num_tiles == 1:
            _accumulate_valid_rows(rp_ref, rt_ref, acc_ref, valid_last)
        elif valid_last == block_rows:
            _accumulate_valid_rows(rp_ref, rt_ref, acc_ref, block_rows)
        else:
            @pl.when(step < num_tiles - 1)
            def _full_block():
                _accumulate_valid_rows(rp_ref, rt_ref, acc_ref, block_rows)

            @pl.when(step == num_tiles - 1)
            def _ragged_block():
                _accumulate_valid_rows(rp_ref, rt_ref, acc_ref, valid_last)

        # ---- finalize: one small XLU reduction + weighted combine ----
        @pl.when(step == num_tiles - 1)
        def _finalize():
            mse = jnp.sum(acc_ref[...]) * inv_recon
            ce = ce_ref[0]
            recon_ref[0, 0] = mse
            total_ref[0, 0] = w_recon * mse + w_cls * ce

    return kernel


def multitask_loss(inputs, targets, loss_weights=None):
    """JAX/Pallas equivalent of MultitaskLoss.forward for the two-task config.

    inputs / targets: dicts with keys "reconstruction" (float tensor, any shape)
    and "classification" (logits [B2, NC] float / int labels [B2]).
    Returns a dict mirroring the PyTorch module's output.
    """
    task_names = ["reconstruction", "classification"]
    if loss_weights is None:
        w = {t: 1.0 / len(task_names) for t in task_names}
    else:
        tot = sum(loss_weights.values())
        w = {t: loss_weights[t] / tot for t in task_names}

    # ---- reconstruction: lane-dense (rows, 128) view, no HBM copy in the
    # common case (tiny pad only when n_elems % 128 != 0) ----------------------
    rp = inputs["reconstruction"]
    rt = targets["reconstruction"]
    n_elems = int(rp.size)
    lane_pad = (-n_elems) % _LANES
    rp_flat = rp.reshape(-1)          # keep native dtype; cast happens in-kernel
    rt_flat = rt.reshape(-1)
    if lane_pad:
        # zero padding contributes 0 to sum((p-t)^2); mean divides by true count
        rp_flat = jnp.pad(rp_flat, (0, lane_pad))
        rt_flat = jnp.pad(rt_flat, (0, lane_pad))
    rows = (n_elems + lane_pad) // _LANES
    rp2 = rp_flat.reshape(rows, _LANES)
    rt2 = rt_flat.reshape(rows, _LANES)

    if rows <= _BLOCK_ROWS:
        block_rows, num_tiles = rows, 1        # block == full dim: always legal
    else:
        block_rows = _BLOCK_ROWS
        num_tiles = -(-rows // block_rows)     # cdiv; ragged last block handled in-kernel
    valid_last = rows - (num_tiles - 1) * block_rows

    # ---- classification: native-dtype logits + int32 labels (no one-hot) ----
    logits = inputs["classification"]
    labels = targets["classification"].astype(jnp.int32).reshape(-1, 1)
    n_cls_rows, n_classes = logits.shape

    kernel = _make_multitask_kernel(
        w_recon=float(w["reconstruction"]),
        w_cls=float(w["classification"]),
        n_recon_elems=n_elems,
        n_cls_rows=int(n_cls_rows),
        num_tiles=int(num_tiles),
        block_rows=int(block_rows),
        valid_last=int(valid_last),
    )

    scalar_out = jax.ShapeDtypeStruct((1, 1), jnp.float32)
    smem_scalar_spec = pl.BlockSpec((1, 1), lambda i: (0, 0),
                                    memory_space=pltpu.MemorySpace.SMEM)

    total, recon_l, cls_l = pl.pallas_call(
        kernel,
        out_shape=(scalar_out, scalar_out, scalar_out),
        grid_spec=pltpu.PrefetchScalarGridSpec(
            num_scalar_prefetch=0,
            grid=(num_tiles,),
            in_specs=[
                pl.BlockSpec((block_rows, _LANES), lambda i: (i, 0)),      # recon pred
                pl.BlockSpec((block_rows, _LANES), lambda i: (i, 0)),      # recon target
                pl.BlockSpec((n_cls_rows, n_classes), lambda i: (0, 0)),   # logits (resident)
                pl.BlockSpec((n_cls_rows, 1), lambda i: (0, 0)),           # labels (resident)
            ],
            out_specs=(smem_scalar_spec, smem_scalar_spec, smem_scalar_spec),
            scratch_shapes=[pltpu.VMEM((_ACC_ROWS, _LANES), jnp.float32),  # acc bank
                            pltpu.SMEM((1,), jnp.float32)],                # ce carry
        ),
        compiler_params=pltpu.CompilerParams(
            dimension_semantics=("arbitrary",),      # reduction axis
            vmem_limit_bytes=32 * 1024 * 1024,       # 16 MiB buffers + <2 MiB temps fits
        ),
    )(rp2, rt2, logits, labels)

    return {
        "loss": total[0, 0],
        "reconstruction_loss": recon_l[0, 0],
        "classification_loss": cls_l[0, 0],
        "reconstruction_weight": jnp.asarray(w["reconstruction"], jnp.float32),
        "classification_weight": jnp.asarray(w["classification"], jnp.float32),
    }


def _reference(inputs, targets, loss_weights):
    """Pure-JAX reference for correctness check."""
    tot = sum(loss_weights.values())
    w = {t: v / tot for t, v in loss_weights.items()}
    rp = inputs["reconstruction"].astype(jnp.float32)
    rt = targets["reconstruction"].astype(jnp.float32)
    mse = jnp.mean((rp - rt) ** 2)
    logits = inputs["classification"].astype(jnp.float32)
    labels = targets["classification"]
    logp = jax.nn.log_softmax(logits, axis=-1)
    ce = -jnp.mean(jnp.take_along_axis(logp, labels[:, None], axis=-1))
    total = w["reconstruction"] * mse + w["classification"] * ce
    return total, mse, ce


def _check(out, inputs, targets, loss_weights, tol=2e-4):
    ref_total, ref_mse, ref_ce = _reference(inputs, targets, loss_weights)
    for got, want in ((out["reconstruction_loss"], ref_mse),
                      (out["classification_loss"], ref_ce),
                      (out["loss"], ref_total)):
        g, r = float(got), float(want)
        assert abs(g - r) <= tol * max(1.0, abs(r)), (g, r)


if __name__ == "__main__":
    key = jax.random.PRNGKey(0)
    loss_weights = {"reconstruction": 1.0, "classification": 2.0}

    # --- primary small-shape test: reconstruction [2,4,16,16], classification [8,16] ---
    k1, k2, k3, k4 = jax.random.split(key, 4)
    B, C, H, W = 2, 4, 16, 16
    B2, NC = 8, 16
    inputs = {
        "reconstruction": jax.random.normal(k1, (B, C, H, W), dtype=jnp.float32),
        "classification": jax.random.normal(k2, (B2, NC), dtype=jnp.float32),
    }
    targets = {
        "reconstruction": jax.random.normal(k3, (B, C, H, W), dtype=jnp.float32),
        "classification": jax.random.randint(k4, (B2,), 0, NC, dtype=jnp.int32),
    }
    out = multitask_loss(inputs, targets, loss_weights)
    out = jax.tree_util.tree_map(jax.block_until_ready, out)
    _check(out, inputs, targets, loss_weights)

    # --- extra check: exercises the chunked fold path (rows=2304 -> pl.loop + rem64) ---
    k5, k6 = jax.random.split(k1, 2)
    inputs2 = dict(inputs)
    targets2 = dict(targets)
    inputs2["reconstruction"] = jax.random.normal(k5, (4, 8, 96, 96), dtype=jnp.float32)
    targets2["reconstruction"] = jax.random.normal(k6, (4, 8, 96, 96), dtype=jnp.float32)
    out2 = multitask_loss(inputs2, targets2, loss_weights)
    out2 = jax.tree_util.tree_map(jax.block_until_ready, out2)
    _check(out2, inputs2, targets2, loss_weights)

    # --- extra check: non-multiple-of-128 element count (tiny lane pad path) ---
    k7, k8 = jax.random.split(k2, 2)
    inputs3 = dict(inputs)
    targets3 = dict(targets)
    inputs3["reconstruction"] = jax.random.normal(k7, (2, 3, 25, 25), dtype=jnp.float32)
    targets3["reconstruction"] = jax.random.normal(k8, (2, 3, 25, 25), dtype=jnp.float32)
    out3 = multitask_loss(inputs3, targets3, loss_weights)
    out3 = jax.tree_util.tree_map(jax.block_until_ready, out3)
    _check(out3, inputs3, targets3, loss_weights)

    # --- extra check: multi-tile grid with ragged last block (rows = 2*8192 + 7) ---
    k9, k10 = jax.random.split(k3, 2)
    inputs4 = dict(inputs)
    targets4 = dict(targets)
    inputs4["reconstruction"] = jax.random.normal(k9, (16391, 128), dtype=jnp.float32)
    targets4["reconstruction"] = jax.random.normal(k10, (16391, 128), dtype=jnp.float32)
    out4 = multitask_loss(inputs4, targets4, loss_weights)
    out4 = jax.tree_util.tree_map(jax.block_until_ready, out4)
    _check(out4, inputs4, targets4, loss_weights)

    print("KERNEL_OK")
</pallas_src>

<mosaic_0001>
module attributes {stable_mosaic.version = 11 : i64} {
  func.func @kernel(%arg0: i32, %arg1: memref<16x128xf32, #tpu.memory_space<vmem>>, %arg2: memref<16x128xf32, #tpu.memory_space<vmem>>, %arg3: memref<8x16xf32, #tpu.memory_space<vmem>>, %arg4: memref<8x1xi32, #tpu.memory_space<vmem>>, %arg5: memref<1x1xf32, #tpu.memory_space<smem>>, %arg6: memref<1x1xf32, #tpu.memory_space<smem>>, %arg7: memref<1x1xf32, #tpu.memory_space<smem>>, %arg8: memref<64x128xf32, #tpu.memory_space<vmem>>, %arg9: memref<1xf32, #tpu.memory_space<smem>>) attributes {dimension_semantics = [#tpu.dimension_semantics<arbitrary>], iteration_bounds = array<i64: 1>, scalar_prefetch = 0 : i64, scratch_operands = 2 : i64, tpu.core_type = #tpu.core_type<tc>, window_params = [{transform_indices = @transform_0, window_bounds = array<i64: 16, 128>}, {transform_indices = @transform_1, window_bounds = array<i64: 16, 128>}, {pipeline_mode = #tpu.pipeline_mode<synchronous>, transform_indices = @transform_2, window_bounds = array<i64: 8, 16>}, {pipeline_mode = #tpu.pipeline_mode<synchronous>, transform_indices = @transform_3, window_bounds = array<i64: 8, 1>}, {transform_indices = @transform_4, window_bounds = array<i64: 1, 1>}, {transform_indices = @transform_5, window_bounds = array<i64: 1, 1>}, {transform_indices = @transform_6, window_bounds = array<i64: 1, 1>}]} {
    %c0_i32 = arith.constant 0 : i32
    %0 = arith.cmpi eq, %arg0, %c0_i32 : i32
    %1 = arith.extui %0 : i1 to i32
    %c0_i32_0 = arith.constant 0 : i32
    %2 = arith.cmpi ne, %1, %c0_i32_0 : i32
    scf.if %2 {
      %cst = arith.constant 0.000000e+00 : f32
      %16 = vector.broadcast %cst : f32 to vector<64x128xf32>
      %c0_12 = arith.constant 0 : index
      %c0_13 = arith.constant 0 : index
      %17 = vector.load %arg8[%c0_12, %c0_13] : memref<64x128xf32, #tpu.memory_space<vmem>>, vector<64x128xf32>
      tpu.vector_store %arg8[%c0_12, %c0_13], %16 {strides = array<i32>} : memref<64x128xf32, #tpu.memory_space<vmem>>, vector<64x128xf32>,
    } else {
    }
    %c0_i32_1 = arith.constant 0 : i32
    %3 = arith.cmpi eq, %arg0, %c0_i32_1 : i32
    %4 = arith.extui %3 : i1 to i32
    %c0_i32_2 = arith.constant 0 : i32
    %5 = arith.cmpi ne, %4, %c0_i32_2 : i32
    scf.if %5 {
      %c0_12 = arith.constant 0 : index
      %c0_13 = arith.constant 0 : index
      %16 = vector.load %arg3[%c0_12, %c0_13] : memref<8x16xf32, #tpu.memory_space<vmem>>, vector<8x16xf32>
      %cst = arith.constant dense<0xFF800000> : vector<8xf32>
      %17 = vector.multi_reduction <maximumf>, %16, %cst [1] : vector<8x16xf32> to vector<8xf32>
      %18 = vector.shape_cast %17 : vector<8xf32> to vector<8x1xf32>
      %19 = vector.broadcast %18 : vector<8x1xf32> to vector<8x16xf32>
      %20 = arith.subf %16, %19 : vector<8x16xf32>
      %21 = math.exp %20 : vector<8x16xf32>
      %cst_14 = arith.constant dense<0.000000e+00> : vector<8xf32>
      %22 = vector.multi_reduction <add>, %21, %cst_14 [1] : vector<8x16xf32> to vector<8xf32>
      %23 = vector.shape_cast %22 : vector<8xf32> to vector<8x1xf32>
      %24 = math.log %23 : vector<8x1xf32>
      %25 = arith.addf %24, %18 : vector<8x1xf32>
      %26 = vector.broadcast %25 : vector<8x1xf32> to vector<8x16xf32>
      %27 = arith.subf %16, %26 : vector<8x16xf32>
      %28 = tpu.iota {dimensions = array<i32: 1>} : vector<8x16xi32>
      %c0_15 = arith.constant 0 : index
      %c0_16 = arith.constant 0 : index
      %29 = vector.load %arg4[%c0_15, %c0_16] : memref<8x1xi32, #tpu.memory_space<vmem>>, vector<8x1xi32>
      %30 = vector.broadcast %29 : vector<8x1xi32> to vector<8x16xi32>
      %31 = arith.cmpi eq, %28, %30 : vector<8x16xi32>
      %32 = arith.extui %31 : vector<8x16xi1> to vector<8x16xi32>
      %33 = arith.sitofp %32 : vector<8x16xi32> to vector<8x16xf32>
      %34 = arith.mulf %33, %27 : vector<8x16xf32>
      %35 = vector.shape_cast %34 : vector<8x16xf32> to vector<1x8x16xf32>
      %cst_17 = arith.constant dense<0.000000e+00> : vector<1xf32>
      %36 = vector.multi_reduction <add>, %35, %cst_17 [1, 2] : vector<1x8x16xf32> to vector<1xf32>
      %37 = vector.shape_cast %36 : vector<1xf32> to vector<1x1x1xf32>
      %38 = vector.extract %37[0, 0, 0] : f32 from vector<1x1x1xf32>
      %cst_18 = arith.constant 0.000000e+00 : f32
      %39 = arith.subf %cst_18, %38 : f32
      %cst_19 = arith.constant 1.250000e-01 : f32
      %40 = arith.mulf %39, %cst_19 : f32
      %c0_20 = arith.constant 0 : index
      %c0_21 = arith.constant 0 : index
      %41 = memref.load %arg7[%c0_20, %c0_21] : memref<1x1xf32, #tpu.memory_space<smem>>
      memref.store %40, %arg7[%c0_20, %c0_21] : memref<1x1xf32, #tpu.memory_space<smem>>
      %c0_22 = arith.constant 0 : index
      %42 = memref.load %arg9[%c0_22] : memref<1xf32, #tpu.memory_space<smem>>
      memref.store %40, %arg9[%c0_22] : memref<1xf32, #tpu.memory_space<smem>>
    } else {
    }
    %c0 = arith.constant 0 : index
    %c0_3 = arith.constant 0 : index
    %6 = vector.load %arg1[%c0, %c0_3] : memref<16x128xf32, #tpu.memory_space<vmem>>, vector<16x128xf32>
    %c0_4 = arith.constant 0 : index
    %c0_5 = arith.constant 0 : index
    %7 = vector.load %arg2[%c0_4, %c0_5] : memref<16x128xf32, #tpu.memory_space<vmem>>, vector<16x128xf32>
    %8 = arith.subf %6, %7 : vector<16x128xf32>
    %c0_6 = arith.constant 0 : index
    %c0_7 = arith.constant 0 : index
    %9 = vector.load %arg8[%c0_6, %c0_7] : memref<64x128xf32, #tpu.memory_space<vmem>>, vector<16x128xf32>
    %10 = arith.mulf %8, %8 : vector<16x128xf32>
    %11 = arith.addf %9, %10 : vector<16x128xf32>
    %c0_8 = arith.constant 0 : index
    %c0_9 = arith.constant 0 : index
    %12 = vector.load %arg8[%c0_8, %c0_9] : memref<64x128xf32, #tpu.memory_space<vmem>>, vector<16x128xf32>
    tpu.vector_store %arg8[%c0_8, %c0_9], %11 {strides = array<i32>} : memref<64x128xf32, #tpu.memory_space<vmem>>, vector<16x128xf32>,
    %c0_i32_10 = arith.constant 0 : i32
    %13 = arith.cmpi eq, %arg0, %c0_i32_10 : i32
    %14 = arith.extui %13 : i1 to i32
    %c0_i32_11 = arith.constant 0 : i32
    %15 = arith.cmpi ne, %14, %c0_i32_11 : i32
    scf.if %15 {
      %c0_12 = arith.constant 0 : index
      %c0_13 = arith.constant 0 : index
      %16 = vector.load %arg8[%c0_12, %c0_13] : memref<64x128xf32, #tpu.memory_space<vmem>>, vector<64x128xf32>
      %17 = vector.shape_cast %16 : vector<64x128xf32> to vector<1x64x128xf32>
      %cst = arith.constant dense<0.000000e+00> : vector<1xf32>
      %18 = vector.multi_reduction <add>, %17, %cst [1, 2] : vector<1x64x128xf32> to vector<1xf32>
      %19 = vector.shape_cast %18 : vector<1xf32> to vector<1x1x1xf32>
      %20 = vector.extract %19[0, 0, 0] : f32 from vector<1x1x1xf32>
      %cst_14 = arith.constant 4.8828125E-4 : f32
      %21 = arith.mulf %20, %cst_14 : f32
      %c0_15 = arith.constant 0 : index
      %22 = memref.load %arg9[%c0_15] : memref<1xf32, #tpu.memory_space<smem>>
      %c0_16 = arith.constant 0 : index
      %c0_17 = arith.constant 0 : index
      %23 = memref.load %arg6[%c0_16, %c0_17] : memref<1x1xf32, #tpu.memory_space<smem>>
      memref.store %21, %arg6[%c0_16, %c0_17] : memref<1x1xf32, #tpu.memory_space<smem>>
      %cst_18 = arith.constant 0.333333343 : f32
      %24 = arith.mulf %cst_18, %21 : f32
      %cst_19 = arith.constant 0.666666686 : f32
      %25 = arith.mulf %cst_19, %22 : f32
      %26 = arith.addf %24, %25 : f32
      %c0_20 = arith.constant 0 : index
      %c0_21 = arith.constant 0 : index
      %27 = memref.load %arg5[%c0_20, %c0_21] : memref<1x1xf32, #tpu.memory_space<smem>>
      memref.store %26, %arg5[%c0_20, %c0_21] : memref<1x1xf32, #tpu.memory_space<smem>>
    } else {
    }
    return
  }
  func.func @transform_0(%arg0: i32) -> (i32, i32) {
    %c0_i32 = arith.constant 0 : i32
    %c0_i32_0 = arith.constant 0 : i32
    return %arg0, %c0_i32 : i32, i32
  }
  func.func @transform_1(%arg0: i32) -> (i32, i32) {
    %c0_i32 = arith.constant 0 : i32
    %c0_i32_0 = arith.constant 0 : i32
    return %arg0, %c0_i32 : i32, i32
  }
  func.func @transform_2(%arg0: i32) -> (i32, i32) {
    %c0_i32 = arith.constant 0 : i32
    %c0_i32_0 = arith.constant 0 : i32
    %c0_i32_1 = arith.constant 0 : i32
    return %c0_i32, %c0_i32_0 : i32, i32
  }
  func.func @transform_3(%arg0: i32) -> (i32, i32) {
    %c0_i32 = arith.constant 0 : i32
    %c0_i32_0 = arith.constant 0 : i32
    %c0_i32_1 = arith.constant 0 : i32
    return %c0_i32, %c0_i32_0 : i32, i32
  }
  func.func @transform_4(%arg0: i32) -> (i32, i32) {
    %c0_i32 = arith.constant 0 : i32
    %c0_i32_0 = arith.constant 0 : i32
    %c0_i32_1 = arith.constant 0 : i32
    return %c0_i32, %c0_i32_0 : i32, i32
  }
  func.func @transform_5(%arg0: i32) -> (i32, i32) {
    %c0_i32 = arith.constant 0 : i32
    %c0_i32_0 = arith.constant 0 : i32
    %c0_i32_1 = arith.constant 0 : i32
    return %c0_i32, %c0_i32_0 : i32, i32
  }
  func.func @transform_6(%arg0: i32) -> (i32, i32) {
    %c0_i32 = arith.constant 0 : i32
    %c0_i32_0 = arith.constant 0 : i32
    %c0_i32_1 = arith.constant 0 : i32
    return %c0_i32, %c0_i32_0 : i32, i32
  }
}

</mosaic_0001>

<bundles_post_ra>
// kernel: tpu_custom_call.1
= control target key start
LH: loop header
LB: loop body
LE: loop exit
PB: predicated region body
PF: predicated region fallthrough
CT: control target
= control target key end

     0   :  { %12 = vsyncpa [#allocation5], 0  ;;  %s406_s0 = inlined_call_operand.hbm [shape: f32[16,128], index: 0, kind: input, shape index: {}]   ;;  %s407_s1 = inlined_call_operand.hbm [shape: f32[16,128], index: 1, kind: input, shape index: {}]   ;;  %s408_s2 = inlined_call_operand.vmem [shape: f32[8,16], index: 2, kind: input, shape index: {}]   ;;  %s409_s3 = inlined_call_operand.vmem [shape: s32[8,1], index: 3, kind: input, shape index: {}]   ;;  %s410_s4 = inlined_call_operand.hbm [shape: f32[1,1], index: 4, kind: output, shape index: {0}]   ;;  %s411_s5 = inlined_call_operand.hbm [shape: f32[1,1], index: 5, kind: output, shape index: {1}]   ;;  %s412_s6 = inlined_call_operand.hbm [shape: f32[1,1], index: 6, kind: output, shape index: {2}]  }
   0x1   :  { %13 = vsyncpa [#allocation8], 0 }
   0x2   :  { %14 = vsyncpa [#allocation6], 0 }
   0x3   :  { %15 = vsyncpa [#allocation11], 0  ;;  %s293_s21 = smov [#allocation4]   ;;  %s211_s25 = scalar_lea.hbm %s406_s0, 256 }
   0x4   :  { %s21_s22 = sshll.u32 %s293_s21, 4  ;;  %p212_p0 = scmp.ne.s32.totalorder %s406_s0, %s211_s25  ;;  %s22_s22 = int_to_ptr.vmem [resolvable:$true] %s21_s22 }
   0x5   :  { %p215_p1 = scmp.lt.u32.totalorder %s211_s25, %s406_s0 }
   0x7   :  { %p217_p2 = pnand %p215_p1, %p212_p0 }
   0x9   :  { %220 = shalt.err (!%p217_p2)
}
   0xa   :  { %s221_s30 = scalar_lea.vmem %s22_s22, 256  ;;  %p226_p4 = scmp.lt.s32.totalorder %s22_s22, %s22_s22 }
   0xb   :  { %p222_p3 = scmp.ne.s32.totalorder %s22_s22, %s221_s30  ;;  %p227_p5 = scmp.lt.s32.totalorder %s221_s30, %s221_s30 }
   0xd   :  { %p228_p6 = por %p227_p5, %p226_p4 }
   0xf   :  { %p229_p7 = pnand %p228_p6, %p222_p3 }
  0x11   :  { %232 = shalt.err (!%p229_p7)
}
  0x12   :  { %s294_s7 = smov 128   ;;  %s295_s8 = smov 8  }
  0x13   :  { %27 = dma.hbm_to_vmem [thread:$0]  %s406_s0, 256, %s22_s22, [#allocation5], %s294_s7, %s294_s7, %s295_s8  }
  0x14   :  { %s296_s11 = smov [#allocation7]   ;;  %s233_s15 = scalar_lea.hbm %s407_s1, 256 }
  0x15   :  { %s33_s12 = sshll.u32 %s296_s11, 4  ;;  %p234_p8 = scmp.ne.s32.totalorder %s407_s1, %s233_s15  ;;  %s34_s12 = int_to_ptr.vmem [resolvable:$true] %s33_s12 }
  0x16   :  { %p237_p9 = scmp.lt.u32.totalorder %s233_s15, %s407_s1 }
  0x18   :  { %p239_p10 = pnand %p237_p9, %p234_p8 }
  0x1a   :  { %242 = shalt.err (!%p239_p10)
}
  0x1b   :  { %s243_s20 = scalar_lea.vmem %s34_s12, 256  ;;  %p248_p12 = scmp.lt.s32.totalorder %s34_s12, %s34_s12 }
  0x1c   :  { %p244_p11 = scmp.ne.s32.totalorder %s34_s12, %s243_s20  ;;  %p249_p13 = scmp.lt.s32.totalorder %s243_s20, %s243_s20 }
  0x1e   :  { %p250_p0 = por %p249_p13, %p248_p12 }
  0x20   :  { %p251_p1 = pnand %p250_p0, %p244_p11 }
  0x22   :  { %254 = shalt.err (!%p251_p1)
}
  0x23   :  { %39 = dma.hbm_to_vmem [thread:$0]  %s407_s1, 256, %s34_s12, [#allocation8], %s294_s7, %s294_s7, %s295_s8  }
  0x24   :  { %285 = dma.done.wait [#allocation5], 256  }
  0x25   :  { %286 = vsyncadd [#allocation5], 4294967040 }
  0x26   :  { %287 = dma.done.wait [#allocation8], 256  }
  0x27   :  { %288 = vsyncadd [#allocation8], 4294967040  ;;  %vm63_vm0 = vcmask 130048   ;;  %v62_v0 = vld [vmem:[%s408_s2] sm:$0xff]  ;;  %v297_v3 = vmov 0   ;;  %v104_v10 = vld [vmem:[#allocation4 + $0x8] sm:$0xff]  ;;  %v77_v19 = vlaneseq }
  0x28   :  { %v64_v1 = vsel %vm63_vm0, %v62_v0, -inf  ;;  %v79_v2 = vld [vmem:[%s409_s3] sm:$0xff]  ;;  %205 = vset.pattern.permute.xlu1 %v297_v3  ;;  %206 = vset.pattern.permute.xlu0 %v297_v3  ;;  %v105_v11 = vld [vmem:[#allocation7] sm:$0xff]  ;;  %v106_v12 = vld [vmem:[#allocation7 + $0x8] sm:$0xff]  ;;  %v298_v25 = vmov 0.0   ;;  %s255_s8 = scalar_lea.hbm %s411_s5, 16 }
  0x29   :  { %65 = vmax.xlane.f32.xlu0 %v64_v1  ;;  %81 = vperm.xlu1 %205, %v79_v2   ;;  %v103_v9 = vld [vmem:[#allocation4] sm:$0xff]  ;;  %v108_v14 = vsub.f32 %v104_v10, %v106_v12  ;;  %v78_v20 = vand.u32 127, %v77_v19  ;;  %p256_p2 = scmp.ne.s32.totalorder %s411_s5, %s255_s8  ;;  %p259_p3 = scmp.lt.u32.totalorder %s255_s8, %s411_s5 }
  0x2a   :  { %v107_v13 = vsub.f32 %v103_v9, %v105_v11 }
  0x2b   :  { %v112_v16 = vmul.f32 %v108_v14, %v108_v14  ;;  %p261_p4 = pnand %p259_p3, %p256_p2 }
  0x2c   :  { %v111_v15 = vmul.f32 %v107_v13, %v107_v13 }
  0x2e   :  { %v128_v17 = vadd.f32 %v112_v16, %v111_v15 }
  0xa8   :  { %v82_v21 = vpop.permute.xlu1 %81 }
  0xa9   :  { %vm83_vm1 = vcmp.eq.s32.totalorder %v78_v20, %v82_v21 }
  0xaa   :  { %v191_v26 = vsel %vm83_vm1, 1.0, %v298_v25 }
  0xb6   :  { %v66_v4 = vpop.xlane.xlu0 %65 }
  0xb7   :  { %v67_v5 = vsub.f32 %v62_v0, %v66_v4 }
  0xb9   :  { %v68_v6 = vmul.f32 1.442695, %v67_v5 }
  0xbb   :  { %207 = vpow2.f32 %v68_v6 }
  0xc5   :  { %v208_v7 = vpop.eup %207 }
  0xc6   :  { %v70_v8 = vsel %vm63_vm0, %v208_v7, 0.0 }
  0xc7   :  { %71 = vadd.xlane.f32.xlu0 %v70_v8 }
  0xcb   :  { %135 = vadd.xlane.f32.xlu0 %v128_v17 }
 0x154   :  { %v72_v18 = vpop.xlane.xlu0 %71 }
 0x155   :  { %209 = vlog2.f32 %v72_v18 }
 0x158   :  { %v136_v30 = vpop.xlane.xlu0 %135 }
 0x159   :  { %v137_v31 = vrot.slane %v136_v30, 4 }
 0x15b   :  { %v138_v32 = vadd.f32 %v137_v31, %v136_v30 }
 0x15d   :  { %v139_v33 = vrot.slane %v138_v32, 2 }
 0x15f   :  { %v210_v22 = vpop.eup %209  ;;  %v140_v37 = vadd.f32 %v139_v33, %v138_v32 }
 0x160   :  { %v74_v23 = vmul.f32 0.6931472, %v210_v22 }
 0x161   :  { %v141_v40 = vrot.slane %v140_v37, 1 }
 0x162   :  { %v75_v24 = vadd.f32 %v74_v23, %v66_v4 }
 0x163   :  { %v142_v43 = vadd.f32 %v141_v40, %v140_v37 }
 0x164   :  { %v76_v27 = vsub.f32 %v62_v0, %v75_v24 }
 0x166   :  { %v86_v28 = vmul.f32 %v191_v26, %v76_v27 }
 0x168   :  { %v87_v29 = vsel %vm63_vm0, %v86_v28, 0.0 }
 0x169   :  { %88 = vadd.xlane.f32.xlu1 %v87_v29 }
 0x1f6   :  { %v89_v34 = vpop.xlane.xlu1 %88 }
 0x1f7   :  { %v90_v35 = vrot.slane %v89_v34, 4 }
 0x1f9   :  { %v91_v36 = vadd.f32 %v90_v35, %v89_v34 }
 0x1fb   :  { %v92_v38 = vrot.slane %v91_v36, 2 }
 0x1fd   :  { %v93_v39 = vadd.f32 %v92_v38, %v91_v36 }
 0x1ff   :  { %v94_v41 = vrot.slane %v93_v39, 1 }
 0x201   :  { %v95_v42 = vadd.f32 %v94_v41, %v93_v39 }
 0x203   :  { %192 = vpush %v95_v42 }
 0x204   :  { %194 = vpush %v142_v43 }
 0x234   :  { %s193_s1 = spop %192 }
 0x235   :  { %s97_s2 = ssub.f32 0.0, %s193_s1  ;;  %s195_s3 = spop %194 }
 0x236   :  { %s144_s26 = smul.f32 0.00048828125, %s195_s3 }
 0x237   :  { %s98_s27 = smul.f32 0.125, %s97_s2 }
 0x238   :  { %s148_s28 = smul.f32 0.33333334, %s144_s26  ;;  %147 = sst [smem:[#allocation10]] %s144_s26 }
 0x239   :  { %100 = sst [smem:[#allocation12]] %s98_s27  ;;  %s149_s29 = smul.f32 0.6666667, %s98_s27 }
 0x23a   :  { %264 = shalt.err (!%p261_p4)
}
 0x23b   :  { %s299_s13 = smov [#allocation10]   ;;  %s150_s16 = sadd.f32 %s149_s29, %s148_s28 }
 0x23c   :  { %168 = dma.smem_to_hbm %s299_s13, 16, %s411_s5, [#allocation11]  }
 0x23d   :  { %s265_s19 = scalar_lea.hbm %s412_s6, 16 }
 0x23e   :  { %p266_p5 = scmp.ne.s32.totalorder %s412_s6, %s265_s19  ;;  %p269_p6 = scmp.lt.u32.totalorder %s265_s19, %s412_s6 }
 0x240   :  { %p271_p7 = pnand %p269_p6, %p266_p5 }
 0x242   :  { %274 = shalt.err (!%p271_p7)
}
 0x243   :  { %s300_s23 = smov [#allocation12]   ;;  %152 = sst [smem:[#allocation9]] %s150_s16 }
 0x244   :  { %176 = dma.smem_to_hbm %s300_s23, 16, %s412_s6, [#allocation11]  }
 0x245   :  { %s275_s2 = scalar_lea.hbm %s410_s4, 16 }
 0x246   :  { %p276_p8 = scmp.ne.s32.totalorder %s410_s4, %s275_s2  ;;  %p279_p9 = scmp.lt.u32.totalorder %s275_s2, %s410_s4 }
 0x248   :  { %p281_p10 = pnand %p279_p9, %p276_p8 }
 0x24a   :  { %284 = shalt.err (!%p281_p10)
}
 0x24b   :  { %s301_s29 = smov [#allocation9]  }
 0x24c   :  { %160 = dma.smem_to_hbm %s301_s29, 16, %s410_s4, [#allocation6]  }
 0x24d   :  { %289 = dma.done.wait [#allocation6], 16  }
 0x24e   :  { %290 = vsyncadd [#allocation6], 4294967280 }
 0x24f   :  { %291 = dma.done.wait [#allocation11], 32  }
 0x250   :  { %292 = vsyncadd [#allocation11], 4294967264 }
 0x251   :  { %186 = sfence }
 0x252   :  { %187 = vsyncpa [#allocation5], 1 }
 0x253   :  { %188 = vsyncpa [#allocation8], 1 }
 0x254   :  { %189 = vsyncpa [#allocation6], 1 }
 0x255   :  { %190 = vsyncpa [#allocation11], 1 }

</bundles_post_ra>
